<compile_context>
chip_gen: v6e
topology: v6e:2x2x1
jax: 0.10.0
libtpu: 0.0.40
codegen_flags: <defaults>
</compile_context>

<pallas_src>
import functools

import jax
import jax.numpy as jnp
from jax.experimental import pallas as pl
from jax.experimental.pallas import tpu as pltpu

LANES = 128
# Anything at or below this goes through a single whole-array block (grid=()).
_SINGLE_BLOCK_MAX_BYTES = 256 * 1024
_WIDTH_CANDIDATES = (4096, 2048, 1024, 512, 256, 128)


def _sharpened_sigmoid_kernel(x_ref, o_ref, *, inv_temp, compute_dtype):
    # VPU mul + EUP exp/recip hide completely under the HBM traffic.
    x = x_ref[...].astype(compute_dtype)
    o_ref[...] = jax.nn.sigmoid(x * inv_temp).astype(o_ref.dtype)


def _chip_params():
    """Generation-aware tiling knobs: per-buffer tile bytes, scoped-VMEM limit,
    TensorCores per chip, native bf16 VPU/EUP availability."""
    kind = ""
    try:
        kind = jax.devices()[0].device_kind.lower()
    except Exception:
        pass
    if "v7" in kind:
        # 3.2 TB/s HBM -> per-step overhead dominates small tiles; go big and
        # raise the scoped-VMEM limit (64 MiB physical) to fit 8 MiB tiles
        # double-buffered on both sides (32 MiB) with headroom.
        return dict(block_bytes=8 << 20, vmem_limit=40 << 20, cores=2, bf16=True)
    if "v6" in kind:
        # 4 MiB tiles x 2 buffers x (in+out) = 16 MiB, within the 32 MiB default.
        return dict(block_bytes=4 << 20, vmem_limit=None, cores=1, bf16=True)
    if "v5e" in kind or "v5 lite" in kind or "v5lite" in kind:
        # 16 MiB default scoped VMEM; ~0.82 TB/s HBM means 2 MiB tiles are
        # already overhead-free, so stay under the default limit.
        return dict(block_bytes=2 << 20, vmem_limit=None, cores=1, bf16=False)
    # Unknown chip: middle-of-the-road tiles with an explicit scoped limit.
    return dict(block_bytes=4 << 20, vmem_limit=32 << 20, cores=1, bf16=False)


def _choose_slab(total):
    """Lane-dense (rows, width) factorization; `total` is a multiple of 128."""
    for cand in _WIDTH_CANDIDATES:
        if total % cand == 0:
            return total // cand, cand
    return 1, total  # unreachable when total % 128 == 0


def _round_up(x, m):
    return -(-x // m) * m


def _choose_block_rows(rows, bytes_per_row, chip, sublane_pack):
    """Pick rows-per-block: target tile bytes, sublane-pack aligned, grid a
    multiple of the TC count, and an exact divisor of rows when cheap."""
    br = (chip["block_bytes"] // bytes_per_row) // sublane_pack * sublane_pack
    br = max(sublane_pack, min(br, rows))

    if rows <= sublane_pack:
        return rows  # full-dim block is always legal

    # Keep the pipeline busy (>=2 steps) and balance v7x's two TensorCores.
    min_grid = max(2, chip["cores"])
    if pl.cdiv(rows, br) < min_grid and rows >= min_grid * sublane_pack:
        br = _round_up(pl.cdiv(rows, min_grid), sublane_pack)

    grid = pl.cdiv(rows, br)
    if chip["cores"] > 1 and grid % chip["cores"] != 0:
        grid = _round_up(grid, chip["cores"])
        br = min(rows, _round_up(pl.cdiv(rows, grid), sublane_pack))

    # Prefer a block_rows that divides rows exactly (no masked final store),
    # searching downward but never below half the target tile.
    if rows % br != 0:
        lo = max(sublane_pack, br // 2)
        for cand in range(br, lo - 1, -sublane_pack):
            if rows % cand == 0 and (
                chip["cores"] == 1 or (rows // cand) % chip["cores"] == 0
            ):
                br = cand
                break
    return br


def _run_tiled(slab, kernel, out_dtype, itemsize, chip):
    rows, width = slab.shape
    sublane_pack = max(8, 32 // itemsize)  # 8 f32, 16 bf16, 32 int8/fp8
    block_rows = _choose_block_rows(rows, width * itemsize, chip, sublane_pack)
    grid = (pl.cdiv(rows, block_rows),)

    cp_kwargs = dict(dimension_semantics=("parallel",))
    if chip["vmem_limit"] is not None:
        cp_kwargs["vmem_limit_bytes"] = chip["vmem_limit"]

    return pl.pallas_call(
        kernel,
        out_shape=jax.ShapeDtypeStruct((rows, width), out_dtype),
        grid_spec=pltpu.PrefetchScalarGridSpec(
            num_scalar_prefetch=0,
            grid=grid,
            in_specs=[pl.BlockSpec((block_rows, width), lambda i: (i, 0))],
            out_specs=pl.BlockSpec((block_rows, width), lambda i: (i, 0)),
        ),
        compiler_params=pltpu.CompilerParams(**cp_kwargs),
    )(slab)


def pallas_sharpened_sigmoid(x, temperature: float = 0.1):
    """Elementwise sigmoid(x / temperature) via a Pallas TPU kernel."""
    orig_shape = x.shape
    dtype = x.dtype
    total = x.size
    if total == 0:
        return x

    chip = _chip_params()
    compute_dtype = (
        jnp.bfloat16 if (dtype == jnp.bfloat16 and chip["bf16"]) else jnp.float32
    )
    kernel = functools.partial(
        _sharpened_sigmoid_kernel,
        inv_temp=float(1.0 / temperature),
        compute_dtype=compute_dtype,
    )
    itemsize = jnp.dtype(dtype).itemsize
    total_bytes = total * itemsize

    # ---- small tensors (ragged or not): one whole-array block, no grid ----
    if total_bytes <= _SINGLE_BLOCK_MAX_BYTES:
        if total % LANES == 0:
            rows, width = _choose_slab(total)
        else:
            rows, width = 1, total
        out = pl.pallas_call(
            kernel,
            out_shape=jax.ShapeDtypeStruct((rows, width), dtype),
        )(x.reshape(rows, width))
        return out.reshape(orig_shape)

    # ---- large ragged tensors: pad <128 elems, stream through tiled path ----
    if total % LANES != 0:
        pad = (-total) % LANES
        flat = jnp.pad(x.reshape(-1), (0, pad))
        rows, width = _choose_slab(total + pad)
        out = _run_tiled(flat.reshape(rows, width), kernel, dtype, itemsize, chip)
        return out.reshape(-1)[:total].reshape(orig_shape)

    # ---- large lane-aligned tensors: lane-dense tiles on a 1-D parallel grid ----
    rows, width = _choose_slab(total)
    out = _run_tiled(x.reshape(rows, width), kernel, dtype, itemsize, chip)
    return out.reshape(orig_shape)


if __name__ == "__main__":
    temperature = 0.1
    key = jax.random.PRNGKey(0)
    k1, k2, k3, k4 = jax.random.split(key, 4)

    # Primary: small VAE-style feature map (NCHW) -> single-block path.
    x = jax.random.normal(k1, (2, 4, 16, 16), dtype=jnp.float32)
    y = jax.block_until_ready(pallas_sharpened_sigmoid(x, temperature))
    ref = jax.nn.sigmoid(x / temperature)
    assert y.shape == x.shape and y.dtype == x.dtype
    assert bool(jnp.allclose(y, ref, rtol=1e-5, atol=1e-5)), "primary mismatch"

    # Larger input -> tiled path with a multi-block parallel grid.
    x2 = jax.random.normal(k2, (4, 16, 128, 128), dtype=jnp.float32)
    y2 = jax.block_until_ready(pallas_sharpened_sigmoid(x2, temperature))
    ref2 = jax.nn.sigmoid(x2 / temperature)
    assert bool(jnp.allclose(y2, ref2, rtol=1e-5, atol=1e-5)), "tiled mismatch"

    # Small ragged element count (not a multiple of 128) -> single-block path.
    x3 = jax.random.normal(k3, (3, 5, 7), dtype=jnp.float32)
    y3 = jax.block_until_ready(pallas_sharpened_sigmoid(x3, temperature))
    ref3 = jax.nn.sigmoid(x3 / temperature)
    assert bool(jnp.allclose(y3, ref3, rtol=1e-5, atol=1e-5)), "small-ragged mismatch"

    # Large ragged element count -> padded lane-aligned tiled path.
    x4 = jax.random.normal(k4, (257, 413), dtype=jnp.float32)
    y4 = jax.block_until_ready(pallas_sharpened_sigmoid(x4, temperature))
    ref4 = jax.nn.sigmoid(x4 / temperature)
    assert bool(jnp.allclose(y4, ref4, rtol=1e-5, atol=1e-5)), "large-ragged mismatch"

    # bf16 activations (compute dtype follows chip bf16 capability).
    x5 = jax.random.normal(k1, (2, 4, 32, 32), dtype=jnp.bfloat16)
    y5 = jax.block_until_ready(pallas_sharpened_sigmoid(x5, temperature))
    ref5 = jax.nn.sigmoid(x5.astype(jnp.float32) / temperature).astype(jnp.bfloat16)
    assert y5.dtype == jnp.bfloat16
    assert bool(
        jnp.allclose(y5.astype(jnp.float32), ref5.astype(jnp.float32), atol=2e-2)
    ), "bf16 mismatch"

    print("KERNEL_OK")
</pallas_src>

<mosaic_0001>
module attributes {stable_mosaic.version = 11 : i64} {
  func.func @_sharpened_sigmoid_kernel(%arg0: memref<1x2048xf32, #tpu.memory_space<vmem>>, %arg1: memref<1x2048xf32, #tpu.memory_space<vmem>>) attributes {dimension_semantics = [], scalar_prefetch = 0 : i64, scratch_operands = 0 : i64, tpu.core_type = #tpu.core_type<tc>} {
    %c0 = arith.constant 0 : index
    %c0_0 = arith.constant 0 : index
    %0 = vector.load %arg0[%c0, %c0_0] : memref<1x2048xf32, #tpu.memory_space<vmem>>, vector<1x2048xf32>
    %cst = arith.constant 1.000000e+01 : f32
    %1 = vector.broadcast %cst : f32 to vector<1x2048xf32>
    %2 = arith.mulf %0, %1 : vector<1x2048xf32>
    %3 = arith.negf %2 : vector<1x2048xf32>
    %4 = math.exp %3 : vector<1x2048xf32>
    %cst_1 = arith.constant 1.000000e+00 : f32
    %5 = vector.broadcast %cst_1 : f32 to vector<1x2048xf32>
    %6 = arith.addf %5, %4 : vector<1x2048xf32>
    %7 = arith.divf %5, %6 : vector<1x2048xf32>
    %c0_2 = arith.constant 0 : index
    %c0_3 = arith.constant 0 : index
    %8 = vector.load %arg1[%c0_2, %c0_3] : memref<1x2048xf32, #tpu.memory_space<vmem>>, vector<1x2048xf32>
    tpu.vector_store %arg1[%c0_2, %c0_3], %7 {strides = array<i32>} : memref<1x2048xf32, #tpu.memory_space<vmem>>, vector<1x2048xf32>,
    return
  }
}

</mosaic_0001>

<bundles_post_ra>
// kernel: tpu_custom_call.1
= control target key start
LH: loop header
LB: loop body
LE: loop exit
PB: predicated region body
PF: predicated region fallthrough
CT: control target
= control target key end

     0   :  { %6 = vsyncpa [#allocation3], 0  ;;  %s128_s0 = inlined_call_operand.hbm [shape: f32[1,2048], index: 0, kind: input, shape index: {}]   ;;  %s129_s1 = inlined_call_operand.hbm [shape: f32[1,2048], index: 1, kind: output, shape index: {}]  }
   0x1   :  { %7 = vsyncpa [#allocation4], 0  ;;  %s110_s6 = smov [#allocation2]  }
   0x2   :  { %s14_s7 = sshll.u32 %s110_s6, 4  ;;  %s15_s7 = int_to_ptr.vmem [resolvable:$true] %s14_s7 }
   0x3   :  { %s74_s8 = scalar_lea.vmem %s15_s7, 256  ;;  %p79_p1 = scmp.lt.s32.totalorder %s15_s7, %s15_s7 }
   0x4   :  { %p75_p0 = scmp.ne.s32.totalorder %s15_s7, %s74_s8  ;;  %p80_p2 = scmp.lt.s32.totalorder %s74_s8, %s74_s8 }
   0x6   :  { %p81_p3 = por %p80_p2, %p79_p1 }
   0x8   :  { %p82_p4 = pnand %p81_p3, %p75_p0 }
   0xa   :  { %85 = shalt.err (!%p82_p4)
}
   0xb   :  { %17 = dma.hbm_to_vmem [thread:$0]  %s128_s0, 256, %s15_s7, [#allocation3]  }
   0xc   :  { %106 = dma.done.wait [#allocation3], 256  }
   0xd   :  { %107 = vsyncadd [#allocation3], 4294967040  ;;  %v21_v0 = vld [vmem:[#allocation2] sm:$0xff]  ;;  %v22_v1 = vld [vmem:[#allocation2 + $0x8] sm:$0xff]  ;;  %s111_s11 = smov [#allocation5]  }
   0xe   :  { %v54_v2 = vmul.f32 -10.0, %v21_v0  ;;  %v55_v3 = vmul.f32 -10.0, %v22_v1  ;;  %s45_s12 = sshll.u32 %s111_s11, 4  ;;  %s46_s12 = int_to_ptr.vmem [resolvable:$true] %s45_s12 }
   0xf   :  { %s86_s0 = scalar_lea.vmem %s46_s12, 256  ;;  %p91_p6 = scmp.lt.s32.totalorder %s46_s12, %s46_s12 }
  0x10   :  { %v27_v4 = vmul.f32 1.442695, %v54_v2  ;;  %v29_v5 = vmul.f32 1.442695, %v55_v3  ;;  %p87_p5 = scmp.ne.s32.totalorder %s46_s12, %s86_s0  ;;  %p92_p7 = scmp.lt.s32.totalorder %s86_s0, %s86_s0 }
  0x12   :  { %58 = vpow2.f32 %v27_v4  ;;  %p93_p8 = por %p92_p7, %p91_p6 }
  0x13   :  { %60 = vpow2.f32 %v29_v5 }
  0x14   :  { %p94_p9 = pnand %p93_p8, %p87_p5 }
  0x1f   :  { %v59_v6 = vpop.eup %58 }
  0x20   :  { %v61_v7 = vpop.eup %60  ;;  %v31_v8 = vadd.f32 1.0, %v59_v6 }
  0x21   :  { %v32_v9 = vadd.f32 1.0, %v61_v7 }
  0x22   :  { %62 = vrcp.f32 %v31_v8 }
  0x23   :  { %64 = vrcp.f32 %v32_v9 }
  0x2f   :  { %v63_v10 = vpop.eup %62 }
  0x30   :  { %v65_v11 = vpop.eup %64  ;;  %37 = vst [vmem:[#allocation5] sm:$0xff] %v63_v10 }
  0x31   :  { %38 = vst [vmem:[#allocation5 + $0x8] sm:$0xff] %v65_v11 }
  0x32   :  { %97 = shalt.err (!%p94_p9)
}
  0x33   :  { %48 = dma.vmem_to_hbm [thread:$0]  %s46_s12, 256, %s129_s1, [#allocation4]  }
  0x34   :  { %108 = dma.done.wait [#allocation4], 256  }
  0x35   :  { %109 = vsyncadd [#allocation4], 4294967040 }
  0x36   :  { %52 = vsyncpa [#allocation3], 1 }
  0x37   :  { %53 = vsyncpa [#allocation4], 1 }

</bundles_post_ra>
